<compile_context>
chip_gen: v7x
topology: tpu7x:2x2x1
jax: 0.10.0
libtpu: 0.0.40
codegen_flags: <defaults>
</compile_context>

<pallas_src>
import jax
import jax.numpy as jnp
from jax.experimental import pallas as pl
from jax.experimental.pallas import tpu as pltpu


def _round_down_multiple(x, m):
    return (x // m) * m


def _vmem_capacity_bytes():
    try:
        return int(pltpu.get_tpu_info().vmem_capacity_bytes)
    except Exception:
        return 64 * 1024 * 1024  # conservative fallback (v7x has 64 MiB / TC)


def _fused_attention_kernel(enc_ref, dec_ref, out_ref):
    """One grid step: (tb, S, H) encoder block + matching (tb, H) decoder rows."""
    enc = enc_ref[...].astype(jnp.float32)   # cast in VMEM (near-free on the VPU)
    dec = dec_ref[...].astype(jnp.float32)

    # VPU batched matvec: broadcast dec over the sequence axis, reduce over H.
    # (An M=1 MXU matmul per row would waste >99% of the systolic array.)
    # TODO(synk): on v7x (~3.2 TB/s HBM) the cross-lane XLU reduce may become the
    #             exposed slot; if bundle dumps show that, route the contraction
    #             through the MXU (dot_general) or refold enc to [B, H, S].
    scores = jnp.sum(enc * dec[:, None, :], axis=-1)        # (tb, S) f32

    # Numerically-stable softmax over the sequence (lane) axis.
    m = jnp.max(scores, axis=-1, keepdims=True)
    e = jnp.exp(scores - m)
    denom = jnp.sum(e, axis=-1, keepdims=True)
    inv = pl.reciprocal(denom, approx=True)                   # EUP slot
    inv = inv * (2.0 - denom * inv)                           # one Newton step ~ f32
    out_ref[...] = (e * inv).astype(out_ref.dtype)


def _scores_kernel(enc_ref, dec_ref, out_ref):
    """Fallback (long-sequence) path: raw scores for one (batch row, S-chunk)."""
    enc = enc_ref[...].astype(jnp.float32)                    # (ts, H)
    dec = dec_ref[...].astype(jnp.float32)                    # (1, H)
    out_ref[...] = jnp.sum(enc * dec, axis=-1, keepdims=True).astype(out_ref.dtype)


def attention(encoder_outputs, decoder_hidden, *, vmem_budget_bytes=None):
    """Dot-product attention weights.

    encoder_outputs: [B, S, H] (native dtype, no HBM copies made)
    decoder_hidden:  [B, H]
    returns:         [B, S] float32 softmax over the sequence axis.
    """
    B, S, H = encoder_outputs.shape
    assert decoder_hidden.shape == (B, H)

    enc_item = jnp.dtype(encoder_outputs.dtype).itemsize
    dec_item = jnp.dtype(decoder_hidden.dtype).itemsize

    vmem_cap = _vmem_capacity_bytes()
    # Leave room for Mosaic internal scratch and unfused temporaries.
    tile_budget = int(vmem_cap * 0.4) if vmem_budget_bytes is None else int(vmem_budget_bytes)

    # Fused-path working set per batch row (double-buffered enc/dec/out blocks
    # plus the f32 cast + elementwise-product temporaries).
    row_bytes = (2 * S * H * enc_item       # enc block, double-buffered
                 + 2 * S * H * 4            # f32 cast + product temporaries
                 + 2 * H * dec_item         # dec block, double-buffered
                 + 3 * S * 4)               # out block + scores

    tb_raw = tile_budget // row_bytes
    if tb_raw >= B:
        tb = B
        # Guarantee >= 2 grid steps so the "parallel" batch axis can shard across
        # both TensorCores on v7x (costs ~0.35 us/step on single-TC chips).
        if B >= 16:
            tb = max(8, _round_down_multiple(-(-B // 2), 8))
    elif tb_raw >= 8:
        tb = _round_down_multiple(tb_raw, 8)  # sublane-align the (tb,H)/(tb,S) blocks
    else:
        tb = 0                                # one fused block does not fit -> fallback

    if tb > 0:
        grid_b = pl.cdiv(B, tb)
        needed = tb * row_bytes
        vmem_limit = int(min(vmem_cap * 3 // 4, max(needed + (8 << 20), 32 << 20)))
        return pl.pallas_call(
            _fused_attention_kernel,
            out_shape=jax.ShapeDtypeStruct((B, S), jnp.float32),
            grid_spec=pltpu.PrefetchScalarGridSpec(
                num_scalar_prefetch=0,
                grid=(grid_b,),
                in_specs=[
                    # Last two dims equal the full array dims -> exempt from the
                    # (8,128) divisibility rule; no wrapper-side padding needed.
                    pl.BlockSpec((tb, S, H), lambda b: (b, 0, 0)),
                    pl.BlockSpec((tb, H), lambda b: (b, 0)),
                ],
                out_specs=pl.BlockSpec((tb, S), lambda b: (b, 0)),
            ),
            compiler_params=pltpu.CompilerParams(
                dimension_semantics=("parallel",),
                vmem_limit_bytes=vmem_limit,
            ),
        )(encoder_outputs, decoder_hidden)

    # ---- Fallback: a single batch row's (S, H) block exceeds the VMEM budget. ----
    # Tile the sequence axis, emit raw scores, and softmax the tiny [B, S] scores
    # in plain JAX (scores traffic is ~1/H of the enc stream).
    # TODO(synk): no H-tiling path; assumes one (128, H) tile fits in VMEM.
    s_row_bytes = 2 * H * enc_item + 2 * H * 4 + 16
    ts = max(128, _round_down_multiple(tile_budget // s_row_bytes, 128))
    if ts >= S:
        ts = S
    needed = ts * s_row_bytes
    vmem_limit = int(min(vmem_cap * 3 // 4, max(needed + (8 << 20), 32 << 20)))

    dec3 = decoder_hidden.reshape(B, 1, H)
    scores = pl.pallas_call(
        _scores_kernel,
        out_shape=jax.ShapeDtypeStruct((B, S, 1), jnp.float32),
        grid_spec=pltpu.PrefetchScalarGridSpec(
            num_scalar_prefetch=0,
            grid=(B, pl.cdiv(S, ts)),
            in_specs=[
                pl.BlockSpec((None, ts, H), lambda b, j: (b, j, 0)),
                pl.BlockSpec((None, 1, H), lambda b, j: (b, 0, 0)),
            ],
            out_specs=pl.BlockSpec((None, ts, 1), lambda b, j: (b, j, 0)),
        ),
        compiler_params=pltpu.CompilerParams(
            dimension_semantics=("parallel", "arbitrary"),
            vmem_limit_bytes=vmem_limit,
        ),
    )(encoder_outputs, dec3)
    return jax.nn.softmax(scores[..., 0], axis=-1)


if __name__ == "__main__":
    # Small shapes consistent with the module: batch=2, seq=8, hid_dim=32.
    B, S, H = 2, 8, 32
    key = jax.random.PRNGKey(0)
    k_enc, k_dec = jax.random.split(key)
    encoder_outputs = jax.random.normal(k_enc, (B, S, H), dtype=jnp.float32)
    decoder_hidden = jax.random.normal(k_dec, (B, H), dtype=jnp.float32)

    attn = attention(encoder_outputs, decoder_hidden)
    jax.block_until_ready(attn)

    ref = jax.nn.softmax(
        jnp.einsum("bsh,bh->bs", encoder_outputs, decoder_hidden), axis=-1
    )
    assert attn.shape == (B, S)
    assert jnp.allclose(attn, ref, atol=1e-4, rtol=1e-4), "fused path mismatch"

    # Also exercise the long-sequence (S-tiled scores) fallback path by forcing a
    # tiny tile budget; still deterministic and small.
    B2, S2, H2 = 2, 256, 32
    k_enc2, k_dec2 = jax.random.split(jax.random.PRNGKey(0))
    enc2 = jax.random.normal(k_enc2, (B2, S2, H2), dtype=jnp.float32)
    dec2 = jax.random.normal(k_dec2, (B2, H2), dtype=jnp.float32)
    attn2 = attention(enc2, dec2, vmem_budget_bytes=16 * 1024)
    jax.block_until_ready(attn2)
    ref2 = jax.nn.softmax(jnp.einsum("bsh,bh->bs", enc2, dec2), axis=-1)
    assert attn2.shape == (B2, S2)
    assert jnp.allclose(attn2, ref2, atol=1e-4, rtol=1e-4), "fallback path mismatch"

    print("KERNEL_OK")
</pallas_src>

<mosaic_0001>
module attributes {stable_mosaic.version = 11 : i64} {
  func.func @_fused_attention_kernel(%arg0: i32, %arg1: memref<2x8x32xf32, #tpu.memory_space<vmem>>, %arg2: memref<2x32xf32, #tpu.memory_space<vmem>>, %arg3: memref<2x8xf32, #tpu.memory_space<vmem>>) attributes {dimension_semantics = [#tpu.dimension_semantics<parallel>], iteration_bounds = array<i64: 1>, scalar_prefetch = 0 : i64, scratch_operands = 0 : i64, tpu.core_type = #tpu.core_type<tc>, window_params = [{transform_indices = @transform_0, window_bounds = array<i64: 2, 8, 32>}, {transform_indices = @transform_1, window_bounds = array<i64: 2, 32>}, {transform_indices = @transform_2, window_bounds = array<i64: 2, 8>}]} {
    %c0 = arith.constant 0 : index
    %c0_0 = arith.constant 0 : index
    %c0_1 = arith.constant 0 : index
    %0 = vector.load %arg1[%c0, %c0_0, %c0_1] : memref<2x8x32xf32, #tpu.memory_space<vmem>>, vector<2x8x32xf32>
    %c0_2 = arith.constant 0 : index
    %c0_3 = arith.constant 0 : index
    %1 = vector.load %arg2[%c0_2, %c0_3] : memref<2x32xf32, #tpu.memory_space<vmem>>, vector<2x32xf32>
    %2 = vector.shape_cast %1 : vector<2x32xf32> to vector<2x1x32xf32>
    %3 = vector.broadcast %2 : vector<2x1x32xf32> to vector<2x8x32xf32>
    %4 = arith.mulf %0, %3 : vector<2x8x32xf32>
    %cst = arith.constant dense<0.000000e+00> : vector<2x8xf32>
    %5 = vector.multi_reduction <add>, %4, %cst [2] : vector<2x8x32xf32> to vector<2x8xf32>
    %cst_4 = arith.constant dense<0xFF800000> : vector<2xf32>
    %6 = vector.multi_reduction <maximumf>, %5, %cst_4 [1] : vector<2x8xf32> to vector<2xf32>
    %7 = vector.shape_cast %6 : vector<2xf32> to vector<2x1xf32>
    %8 = vector.broadcast %7 : vector<2x1xf32> to vector<2x8xf32>
    %9 = arith.subf %5, %8 : vector<2x8xf32>
    %10 = math.exp %9 : vector<2x8xf32>
    %cst_5 = arith.constant dense<0.000000e+00> : vector<2xf32>
    %11 = vector.multi_reduction <add>, %10, %cst_5 [1] : vector<2x8xf32> to vector<2xf32>
    %12 = vector.shape_cast %11 : vector<2xf32> to vector<2x1xf32>
    %13 = tpu.reciprocal %12 {approx = true} : vector<2x1xf32> -> vector<2x1xf32>
    %14 = arith.mulf %12, %13 : vector<2x1xf32>
    %cst_6 = arith.constant 2.000000e+00 : f32
    %15 = vector.broadcast %cst_6 : f32 to vector<2x1xf32>
    %16 = arith.subf %15, %14 : vector<2x1xf32>
    %17 = arith.mulf %13, %16 : vector<2x1xf32>
    %18 = vector.broadcast %17 : vector<2x1xf32> to vector<2x8xf32>
    %19 = arith.mulf %10, %18 : vector<2x8xf32>
    %c0_7 = arith.constant 0 : index
    %c0_8 = arith.constant 0 : index
    %20 = vector.load %arg3[%c0_7, %c0_8] : memref<2x8xf32, #tpu.memory_space<vmem>>, vector<2x8xf32>
    tpu.vector_store %arg3[%c0_7, %c0_8], %19 {strides = array<i32>} : memref<2x8xf32, #tpu.memory_space<vmem>>, vector<2x8xf32>,
    return
  }
  func.func @transform_0(%arg0: i32) -> (i32, i32, i32) {
    %c0_i32 = arith.constant 0 : i32
    %c0_i32_0 = arith.constant 0 : i32
    %c0_i32_1 = arith.constant 0 : i32
    return %arg0, %c0_i32, %c0_i32_0 : i32, i32, i32
  }
  func.func @transform_1(%arg0: i32) -> (i32, i32) {
    %c0_i32 = arith.constant 0 : i32
    %c0_i32_0 = arith.constant 0 : i32
    return %arg0, %c0_i32 : i32, i32
  }
  func.func @transform_2(%arg0: i32) -> (i32, i32) {
    %c0_i32 = arith.constant 0 : i32
    %c0_i32_0 = arith.constant 0 : i32
    return %arg0, %c0_i32 : i32, i32
  }
}

</mosaic_0001>

<bundles_post_ra>
// kernel: tpu_custom_call.1
= control target key start
LH: loop header
LB: loop body
LE: loop exit
PB: predicated region body
PF: predicated region fallthrough
CT: control target
= control target key end

     0   :  { %7 = vsyncpa [#allocation3], 0  ;;  %s304_s0 = inlined_call_operand.hbm [shape: f32[2,8,32], index: 0, kind: input, shape index: {}]   ;;  %s305_s1 = inlined_call_operand.vmem [shape: f32[2,32], index: 1, kind: input, shape index: {}]   ;;  %s306_s2 = inlined_call_operand.hbm [shape: f32[2,8], index: 2, kind: output, shape index: {}]  }
   0x1   :  { %8 = vsyncpa [#allocation4], 0  ;;  %s242_s9 = smov [#allocation2]   ;;  %s194_s13 = scalar_lea.hbm %s304_s0, 256 }
   0x2   :  { %s14_s10 = sshll.u32 %s242_s9, 4  ;;  %p195_p0 = scmp.ne.s32.totalorder %s304_s0, %s194_s13  ;;  %s15_s10 = int_to_ptr.vmem [resolvable:$true] %s14_s10 }
   0x3   :  { %p198_p1 = scmp.lt.u32.totalorder %s194_s13, %s304_s0 }
   0x5   :  { %p200_p2 = pnand %p198_p1, %p195_p0 }
   0x7   :  { %203 = shalt.err (!%p200_p2)
}
   0x8   :  { %s204_s18 = scalar_lea.vmem %s15_s10, 256  ;;  %p209_p4 = scmp.lt.s32.totalorder %s15_s10, %s15_s10 }
   0x9   :  { %p205_p3 = scmp.ne.s32.totalorder %s15_s10, %s204_s18  ;;  %p210_p5 = scmp.lt.s32.totalorder %s204_s18, %s204_s18 }
   0xb   :  { %p211_p6 = por %p210_p5, %p209_p4 }
   0xd   :  { %p212_p7 = pnand %p211_p6, %p205_p3 }
   0xf   :  { %215 = shalt.err (!%p212_p7)
}
  0x10   :  { %s243_s19 = smov 128   ;;  %s244_s20 = smov 8  }
  0x11   :  { %20 = dma.hbm_to_vmem [thread:$0]  %s304_s0, 256, %s15_s10, [#allocation3], %s243_s19, %s243_s19, %s244_s20  }
  0x12   :  { %238 = dma.done.wait [#allocation3], 256  }
  0x13   :  { %239 = vsyncadd [#allocation3], 4294967040  ;;  %v41_v0 = vlaneseq  ;;  %v245_v1 = vmov 1966171168   ;;  %v26_v12 = vld [vmem:[#allocation2] sm:$0xff]  ;;  %vm64_vm0 = vcmask 261120  }
  0x14   :  { %v39_v2 = vunpack.c.l.s4 %v245_v1  ;;  %v179_v9 = vld.sshfl [vmem:[%s305_s1] sm:$0x11 pattern:$0x75316420]  ;;  %v27_v15 = vld [vmem:[#allocation2 + $0x8] sm:$0xff]  ;;  %vm83_vm1 = vcmask 1041409  }
  0x15   :  { %v42_v3 = vshrl.u32 %v41_v0, 7  ;;  %v74_v4 = vand.u32 127, %v41_v0  ;;  %v37_v10 = vcombine.high %v179_v9, %v179_v9  ;;  %vm86_vm2 = vcmask 58368   ;;  %s247_s0 = smov [#allocation5]  }
  0x16   :  { %v40_v5 = vunpack.c.0.s8 %v39_v2  ;;  %v246_v27 = vmov 0   ;;  %s170_s1 = sshll.u32 %s247_s0, 4  ;;  %s171_s1 = int_to_ptr.vmem [resolvable:$true] %s170_s1 }
  0x17   :  { %v275_v6 = vsub.s32 %v74_v4, %v42_v3  ;;  %v54_v8 = vsub.s32 0, %v42_v3  ;;  %187 = vset.pattern.permute.xlu0 %v246_v27  ;;  %186 = vset.pattern.permute.xlu1 %v246_v27  ;;  %v97_v28 = vsub.s32 1, %v42_v3  ;;  %s216_s25 = scalar_lea.vmem %s171_s1, 32  ;;  %p221_p9 = scmp.lt.s32.totalorder %s171_s1, %s171_s1 }
  0x18   :  { %v43_v7 = vsub.s32 %v40_v5, %v42_v3  ;;  %p217_p8 = scmp.ne.s32.totalorder %s171_s1, %s216_s25  ;;  %p222_p10 = scmp.lt.s32.totalorder %s216_s25, %s216_s25 }
  0x1a   :  { %v44_v11 = vrot.slane %v179_v9, %v43_v7  ;;  %v51_v14 = vrot.slane %v37_v10, %v43_v7  ;;  %p223_p11 = por %p222_p10, %p221_p9 }
  0x1c   :  { %v55_v13 = vrot.slane %v44_v11, %v54_v8  ;;  %v59_v17 = vrot.slane %v51_v14, %v54_v8  ;;  %p224_p12 = pnand %p223_p11, %p217_p8 }
  0x1e   :  { %v62_v16 = vmul.f32 %v55_v13, %v26_v12  ;;  %v63_v19 = vmul.f32 %v59_v17, %v27_v15 }
  0x20   :  { %v65_v18 = vsel %vm64_vm0, %v62_v16, 0.0  ;;  %v68_v20 = vsel %vm64_vm0, %v63_v19, 0.0 }
  0x21   :  { %66 = vadd.xlane.f32.xlu0 %v65_v18 }
  0x25   :  { %69 = vadd.xlane.f32.xlu0 %v68_v20 }
  0xae   :  { %v67_v21 = vpop.xlane.xlu0 %66 }
  0xaf   :  { %v78_v23 = vrot.slane %v67_v21, %v275_v6 }
  0xb2   :  { %v70_v22 = vpop.xlane.xlu0 %69 }
  0xb3   :  { %v82_v24 = vrot.slane %v70_v22, %v275_v6 }
  0xb5   :  { %v84_v25 = vsel %vm83_vm1, %v82_v24, %v78_v23 }
  0xb6   :  { %v87_v26 = vsel %vm86_vm2, %v84_v25, -inf }
  0xb7   :  { %88 = vmax.xlane.f32.xlu1 %v87_v26 }
 0x144   :  { %v89_v29 = vpop.xlane.xlu1 %88 }
 0x145   :  { %v94_v30 = vrot.slane %v89_v29, %v54_v8  ;;  %v98_v31 = vrot.slane %v89_v29, %v97_v28 }
 0x147   :  { %v101_v32 = vsub.f32 %v67_v21, %v94_v30  ;;  %v102_v33 = vsub.f32 %v70_v22, %v98_v31 }
 0x149   :  { %v103_v34 = vmul.f32 1.442695, %v101_v32  ;;  %v105_v35 = vmul.f32 1.442695, %v102_v33 }
 0x14b   :  { %188 = vpow2.f32 %v103_v34 }
 0x14c   :  { %190 = vpow2.f32 %v105_v35 }
 0x155   :  { %v189_v36 = vpop.eup %188 }
 0x156   :  { %v191_v37 = vpop.eup %190  ;;  %110 = vperm.xlu1 %186, %v189_v36  }
 0x157   :  { %113 = vperm.xlu0 %187, %v191_v37  }
 0x1d5   :  { %v111_v38 = vpop.permute.xlu1 %110 }
 0x1d6   :  { %v114_v39 = vpop.permute.xlu0 %113  ;;  %v118_v40 = vrot.slane %v111_v38, %v275_v6 }
 0x1d7   :  { %v122_v41 = vrot.slane %v114_v39, %v275_v6 }
 0x1d9   :  { %v123_v42 = vsel %vm83_vm1, %v122_v41, %v118_v40 }
 0x1da   :  { %v125_v43 = vsel %vm86_vm2, %v123_v42, 0.0 }
 0x1db   :  { %126 = vadd.xlane.f32.xlu1 %v125_v43 }
 0x268   :  { %v127_v44 = vpop.xlane.xlu1 %126 }
 0x269   :  { %192 = vrcp.f32 %v127_v44 }
 0x273   :  { %v193_v45 = vpop.eup %192 }
 0x274   :  { %v129_v46 = vmul.f32 %v193_v45, %v127_v44 }
 0x276   :  { %v130_v47 = vsub.f32 2.0, %v129_v46 }
 0x278   :  { %v131_v48 = vmul.f32 %v193_v45, %v130_v47 }
 0x27a   :  { %v136_v49 = vrot.slane %v131_v48, %v54_v8  ;;  %v140_v50 = vrot.slane %v131_v48, %v97_v28 }
 0x27c   :  { %v143_v51 = vmul.f32 %v189_v36, %v136_v49  ;;  %v144_v52 = vmul.f32 %v191_v37, %v140_v50 }
 0x27e   :  { %148 = vperm.xlu0 %187, %v143_v51  }
 0x282   :  { %151 = vperm.xlu0 %187, %v144_v52  }
 0x2fd   :  { %v149_v53 = vpop.permute.xlu0 %148 }
 0x2fe   :  { %v156_v55 = vrot.slane %v149_v53, %v275_v6 }
 0x301   :  { %v152_v54 = vpop.permute.xlu0 %151 }
 0x302   :  { %v160_v56 = vrot.slane %v152_v54, %v275_v6 }
 0x304   :  { %v161_v57 = vsel %vm83_vm1, %v160_v56, %v156_v55 }
 0x305   :  { %163 = vst.msk [vmem:[#allocation5] sm:$0x3] %vm86_vm2, %v161_v57 }
 0x306   :  { %227 = shalt.err (!%p224_p12)
}
 0x307   :  { %s228_s28 = scalar_lea.hbm %s306_s2, 32 }
 0x308   :  { %p229_p13 = scmp.ne.s32.totalorder %s306_s2, %s228_s28  ;;  %p232_p0 = scmp.lt.u32.totalorder %s228_s28, %s306_s2 }
 0x30a   :  { %p234_p1 = pnand %p232_p0, %p229_p13 }
 0x30c   :  { %237 = shalt.err (!%p234_p1)
}
 0x30d   :  { %173 = dma.vmem_to_hbm [thread:$0]  %s171_s1, 32, %s306_s2, [#allocation4]  }
 0x30e   :  { %240 = dma.done.wait [#allocation4], 32  }
 0x30f   :  { %241 = vsyncadd [#allocation4], 4294967264 }
 0x310   :  { %177 = vsyncpa [#allocation3], 1 }
 0x311   :  { %178 = vsyncpa [#allocation4], 1 }

</bundles_post_ra>
